<compile_context>
chip_gen: v7x
topology: tpu7x:2x2x1
jax: 0.10.0
libtpu: 0.0.40
codegen_flags: <defaults>
</compile_context>

<pallas_src>
import jax
import jax.numpy as jnp
from jax.experimental import pallas as pl
from jax.experimental.pallas import tpu as pltpu

BN_EPS = 1e-5
OUT_PAD = 128  # lane-dense output width (assumes out_ch <= 128)


def _bn_train_fused(h, gamma, beta):
    """Training-mode BatchNorm1d, single stats pass, fused scale/shift."""
    inv_n = 1.0 / h.shape[0]
    mu = jnp.sum(h, axis=0, keepdims=True) * inv_n
    ex2 = jnp.sum(h * h, axis=0, keepdims=True) * inv_n
    var = ex2 - mu * mu                       # biased variance
    scale = gamma * jax.lax.rsqrt(var + BN_EPS)
    shift = beta - mu * scale
    return h * scale + shift                  # one FMA-shaped pass


def sign_language_block_kernel(
    x_ref,        # (B, in_ch)        f32
    w1_ref,       # (in_ch, 1024)     bf16
    gb1_ref,      # (2, 1024)         f32   [gamma1; beta1]
    w2_ref,       # (1024, 128)       bf16
    w3_ref,       # (128, 128)        bf16
    vecs_ref,     # (4, 128)          f32   [b2; gamma3; beta3; b4_pad]
    w4_ref,       # (128, 128)        bf16  (N zero-padded to 128)
    o_ref,        # (B, 128)          f32
):
    x = x_ref[...]
    gb1 = gb1_ref[...]
    vecs = vecs_ref[...]

    # Linear(in_ch, 1024)  [bias dropped: cancels under train-mode BN] + BN + ReLU
    h = jnp.dot(x, w1_ref[...].astype(jnp.float32),
                preferred_element_type=jnp.float32)
    h = _bn_train_fused(h, gb1[0:1, :], gb1[1:2, :])
    h = jnp.maximum(h, 0.0)

    # Linear(1024, 128) + Tanh
    h = jnp.dot(h, w2_ref[...].astype(jnp.float32),
                preferred_element_type=jnp.float32) + vecs[0:1, :]
    h = jnp.tanh(h)

    # Linear(128, 128)  [bias dropped: cancels under train-mode BN] + BN + ReLU
    h = jnp.dot(h, w3_ref[...].astype(jnp.float32),
                preferred_element_type=jnp.float32)
    h = _bn_train_fused(h, vecs[1:2, :], vecs[2:3, :])
    h = jnp.maximum(h, 0.0)

    # Linear(128, out_ch padded to 128) + Tanh  (lane-dense store)
    h = jnp.dot(h, w4_ref[...].astype(jnp.float32),
                preferred_element_type=jnp.float32) + vecs[3:4, :]
    o_ref[...] = jnp.tanh(h).astype(o_ref.dtype)


def sign_language_block(x, packed, out_ch):
    """x: (B, in_ch) f32.  packed: dict from pack_params().  Returns (B, out_ch)."""
    B = x.shape[0]
    vmem = pl.BlockSpec(memory_space=pltpu.MemorySpace.VMEM)
    args = (
        x,
        packed["w1"], packed["gb1"],
        packed["w2"],
        packed["w3"], packed["vecs"],
        packed["w4"],
    )
    out = pl.pallas_call(
        sign_language_block_kernel,
        out_shape=jax.ShapeDtypeStruct((B, OUT_PAD), jnp.float32),
        in_specs=[vmem] * len(args),
        out_specs=vmem,
    )(*args)
    return out[:, :out_ch]


def init_params(key, in_ch, out_ch):
    """Raw f32 parameters mirroring the PyTorch module (Linear default init)."""
    def linear(k, fan_in, fan_out):
        kw, kb = jax.random.split(k)
        bound = 1.0 / jnp.sqrt(fan_in)
        w = jax.random.uniform(kw, (fan_in, fan_out), jnp.float32, -bound, bound)
        b = jax.random.uniform(kb, (1, fan_out), jnp.float32, -bound, bound)
        return w, b

    k1, k2, k3, k4 = jax.random.split(key, 4)
    w1, b1 = linear(k1, in_ch, 1024)
    w2, b2 = linear(k2, 1024, 128)
    w3, b3 = linear(k3, 128, 128)
    w4, b4 = linear(k4, 128, out_ch)
    return {
        "w1": w1, "b1": b1,
        "g1": jnp.ones((1, 1024), jnp.float32), "be1": jnp.zeros((1, 1024), jnp.float32),
        "w2": w2, "b2": b2,
        "w3": w3, "b3": b3,
        "g3": jnp.ones((1, 128), jnp.float32), "be3": jnp.zeros((1, 128), jnp.float32),
        "w4": w4, "b4": b4,
    }


def pack_params(p, out_ch):
    """Kernel-side packing: bf16 weights, packed per-feature vectors, padded output dim."""
    assert out_ch <= OUT_PAD, "this packing assumes out_ch <= 128"
    w4_pad = jnp.zeros((128, OUT_PAD), jnp.float32).at[:, :out_ch].set(p["w4"])
    b4_pad = jnp.zeros((1, OUT_PAD), jnp.float32).at[:, :out_ch].set(p["b4"])
    return {
        "w1": p["w1"].astype(jnp.bfloat16),
        "gb1": jnp.concatenate([p["g1"], p["be1"]], axis=0),          # (2,1024) f32
        "w2": p["w2"].astype(jnp.bfloat16),
        "w3": p["w3"].astype(jnp.bfloat16),
        "vecs": jnp.concatenate([p["b2"], p["g3"], p["be3"], b4_pad], axis=0),  # (4,128) f32
        "w4": w4_pad.astype(jnp.bfloat16),
    }


def _bn_ref(h, gamma, beta):
    # Exact two-pass training-mode BatchNorm1d (PyTorch semantics).
    mu = jnp.mean(h, axis=0, keepdims=True)
    var = jnp.mean((h - mu) * (h - mu), axis=0, keepdims=True)
    return (h - mu) * jax.lax.rsqrt(var + BN_EPS) * gamma + beta


def reference_forward(x, packed, b1, b3, out_ch):
    """Pure-JAX reference using the same bf16-rounded weights as the kernel.

    b1/b3 ARE applied here (as in PyTorch) to verify they cancel under BN.
    """
    w1 = packed["w1"].astype(jnp.float32)
    w2 = packed["w2"].astype(jnp.float32)
    w3 = packed["w3"].astype(jnp.float32)
    w4 = packed["w4"].astype(jnp.float32)
    g1, be1 = packed["gb1"][0:1], packed["gb1"][1:2]
    b2, g3, be3, b4 = (packed["vecs"][i:i + 1] for i in range(4))

    h = x @ w1 + b1
    h = jnp.maximum(_bn_ref(h, g1, be1), 0.0)
    h = jnp.tanh(h @ w2 + b2)
    h = h @ w3 + b3
    h = jnp.maximum(_bn_ref(h, g3, be3), 0.0)
    return jnp.tanh(h @ w4 + b4)[:, :out_ch]


if __name__ == "__main__":
    B, IN_CH, OUT_CH = 8, 32, 16

    key = jax.random.PRNGKey(0)
    kx, kp = jax.random.split(key)
    x = jax.random.normal(kx, (B, IN_CH), jnp.float32)

    raw = init_params(kp, IN_CH, OUT_CH)
    packed = pack_params(raw, OUT_CH)

    out = sign_language_block(x, packed, OUT_CH)
    out = jax.block_until_ready(out)

    ref = reference_forward(x, packed, raw["b1"], raw["b3"], OUT_CH)

    assert out.shape == (B, OUT_CH)
    assert jnp.all(jnp.isfinite(out))
    assert jnp.allclose(out, ref, atol=1e-4, rtol=1e-4)

    print("KERNEL_OK")
</pallas_src>

<mosaic_0001>
module attributes {stable_mosaic.version = 11 : i64} {
  func.func @sign_language_block_kernel(%arg0: memref<8x32xf32, #tpu.memory_space<vmem>>, %arg1: memref<32x1024xbf16, #tpu.memory_space<vmem>>, %arg2: memref<2x1024xf32, #tpu.memory_space<vmem>>, %arg3: memref<1024x128xbf16, #tpu.memory_space<vmem>>, %arg4: memref<128x128xbf16, #tpu.memory_space<vmem>>, %arg5: memref<4x128xf32, #tpu.memory_space<vmem>>, %arg6: memref<128x128xbf16, #tpu.memory_space<vmem>>, %arg7: memref<8x128xf32, #tpu.memory_space<vmem>>) attributes {dimension_semantics = [], scalar_prefetch = 0 : i64, scratch_operands = 0 : i64, tpu.core_type = #tpu.core_type<tc>} {
    %c0 = arith.constant 0 : index
    %c0_0 = arith.constant 0 : index
    %0 = vector.load %arg0[%c0, %c0_0] : memref<8x32xf32, #tpu.memory_space<vmem>>, vector<8x32xf32>
    %c0_1 = arith.constant 0 : index
    %c0_2 = arith.constant 0 : index
    %1 = vector.load %arg2[%c0_1, %c0_2] : memref<2x1024xf32, #tpu.memory_space<vmem>>, vector<2x1024xf32>
    %c0_3 = arith.constant 0 : index
    %c0_4 = arith.constant 0 : index
    %2 = vector.load %arg5[%c0_3, %c0_4] : memref<4x128xf32, #tpu.memory_space<vmem>>, vector<4x128xf32>
    %c0_5 = arith.constant 0 : index
    %c0_6 = arith.constant 0 : index
    %3 = vector.load %arg1[%c0_5, %c0_6] : memref<32x1024xbf16, #tpu.memory_space<vmem>>, vector<32x1024xbf16>
    %4 = arith.extf %3 : vector<32x1024xbf16> to vector<32x1024xf32>
    %cst = arith.constant dense<0.000000e+00> : vector<8x1024xf32>
    %5 = tpu.matmul %0, %4, %cst {dimension_numbers = #tpu.dot_dimension_numbers<[1], [0], [0], [1], [0, 0, 1, 1], [], []>} : vector<8x32xf32>, vector<32x1024xf32>, vector<8x1024xf32> -> vector<8x1024xf32>
    %6 = vector.extract_strided_slice %1 {offsets = [0, 0], sizes = [1, 1024], strides = [1, 1]} : vector<2x1024xf32> to vector<1x1024xf32>
    %7 = vector.extract_strided_slice %1 {offsets = [1, 0], sizes = [1, 1024], strides = [1, 1]} : vector<2x1024xf32> to vector<1x1024xf32>
    %cst_7 = arith.constant dense<0.000000e+00> : vector<1024xf32>
    %8 = vector.multi_reduction <add>, %5, %cst_7 [0] : vector<8x1024xf32> to vector<1024xf32>
    %9 = vector.shape_cast %8 : vector<1024xf32> to vector<1x1024xf32>
    %cst_8 = arith.constant 1.250000e-01 : f32
    %10 = vector.broadcast %cst_8 : f32 to vector<1x1024xf32>
    %11 = arith.mulf %9, %10 : vector<1x1024xf32>
    %12 = arith.mulf %5, %5 : vector<8x1024xf32>
    %cst_9 = arith.constant dense<0.000000e+00> : vector<1024xf32>
    %13 = vector.multi_reduction <add>, %12, %cst_9 [0] : vector<8x1024xf32> to vector<1024xf32>
    %14 = vector.shape_cast %13 : vector<1024xf32> to vector<1x1024xf32>
    %cst_10 = arith.constant 1.250000e-01 : f32
    %15 = vector.broadcast %cst_10 : f32 to vector<1x1024xf32>
    %16 = arith.mulf %14, %15 : vector<1x1024xf32>
    %17 = arith.mulf %11, %11 : vector<1x1024xf32>
    %18 = arith.subf %16, %17 : vector<1x1024xf32>
    %cst_11 = arith.constant 9.99999974E-6 : f32
    %19 = vector.broadcast %cst_11 : f32 to vector<1x1024xf32>
    %20 = arith.addf %18, %19 : vector<1x1024xf32>
    %21 = math.rsqrt %20 : vector<1x1024xf32>
    %22 = arith.mulf %6, %21 : vector<1x1024xf32>
    %23 = arith.mulf %11, %22 : vector<1x1024xf32>
    %24 = arith.subf %7, %23 : vector<1x1024xf32>
    %25 = vector.broadcast %22 : vector<1x1024xf32> to vector<8x1024xf32>
    %26 = arith.mulf %5, %25 : vector<8x1024xf32>
    %27 = vector.broadcast %24 : vector<1x1024xf32> to vector<8x1024xf32>
    %28 = arith.addf %26, %27 : vector<8x1024xf32>
    %cst_12 = arith.constant 0.000000e+00 : f32
    %29 = vector.broadcast %cst_12 : f32 to vector<8x1024xf32>
    %30 = arith.maximumf %28, %29 : vector<8x1024xf32>
    %c0_13 = arith.constant 0 : index
    %c0_14 = arith.constant 0 : index
    %31 = vector.load %arg3[%c0_13, %c0_14] : memref<1024x128xbf16, #tpu.memory_space<vmem>>, vector<1024x128xbf16>
    %32 = arith.extf %31 : vector<1024x128xbf16> to vector<1024x128xf32>
    %cst_15 = arith.constant dense<0.000000e+00> : vector<8x128xf32>
    %33 = tpu.matmul %30, %32, %cst_15 {dimension_numbers = #tpu.dot_dimension_numbers<[1], [0], [0], [1], [0, 0, 1, 1], [], []>} : vector<8x1024xf32>, vector<1024x128xf32>, vector<8x128xf32> -> vector<8x128xf32>
    %34 = vector.extract_strided_slice %2 {offsets = [0, 0], sizes = [1, 128], strides = [1, 1]} : vector<4x128xf32> to vector<1x128xf32>
    %35 = vector.broadcast %34 : vector<1x128xf32> to vector<8x128xf32>
    %36 = arith.addf %33, %35 : vector<8x128xf32>
    %37 = math.tanh %36 : vector<8x128xf32>
    %c0_16 = arith.constant 0 : index
    %c0_17 = arith.constant 0 : index
    %38 = vector.load %arg4[%c0_16, %c0_17] : memref<128x128xbf16, #tpu.memory_space<vmem>>, vector<128x128xbf16>
    %39 = arith.extf %38 : vector<128x128xbf16> to vector<128x128xf32>
    %cst_18 = arith.constant dense<0.000000e+00> : vector<8x128xf32>
    %40 = tpu.matmul %37, %39, %cst_18 {dimension_numbers = #tpu.dot_dimension_numbers<[1], [0], [0], [1], [0, 0, 1, 1], [], []>} : vector<8x128xf32>, vector<128x128xf32>, vector<8x128xf32> -> vector<8x128xf32>
    %41 = vector.extract_strided_slice %2 {offsets = [1, 0], sizes = [1, 128], strides = [1, 1]} : vector<4x128xf32> to vector<1x128xf32>
    %42 = vector.extract_strided_slice %2 {offsets = [2, 0], sizes = [1, 128], strides = [1, 1]} : vector<4x128xf32> to vector<1x128xf32>
    %cst_19 = arith.constant dense<0.000000e+00> : vector<128xf32>
    %43 = vector.multi_reduction <add>, %40, %cst_19 [0] : vector<8x128xf32> to vector<128xf32>
    %44 = vector.shape_cast %43 : vector<128xf32> to vector<1x128xf32>
    %cst_20 = arith.constant 1.250000e-01 : f32
    %45 = vector.broadcast %cst_20 : f32 to vector<1x128xf32>
    %46 = arith.mulf %44, %45 : vector<1x128xf32>
    %47 = arith.mulf %40, %40 : vector<8x128xf32>
    %cst_21 = arith.constant dense<0.000000e+00> : vector<128xf32>
    %48 = vector.multi_reduction <add>, %47, %cst_21 [0] : vector<8x128xf32> to vector<128xf32>
    %49 = vector.shape_cast %48 : vector<128xf32> to vector<1x128xf32>
    %cst_22 = arith.constant 1.250000e-01 : f32
    %50 = vector.broadcast %cst_22 : f32 to vector<1x128xf32>
    %51 = arith.mulf %49, %50 : vector<1x128xf32>
    %52 = arith.mulf %46, %46 : vector<1x128xf32>
    %53 = arith.subf %51, %52 : vector<1x128xf32>
    %cst_23 = arith.constant 9.99999974E-6 : f32
    %54 = vector.broadcast %cst_23 : f32 to vector<1x128xf32>
    %55 = arith.addf %53, %54 : vector<1x128xf32>
    %56 = math.rsqrt %55 : vector<1x128xf32>
    %57 = arith.mulf %41, %56 : vector<1x128xf32>
    %58 = arith.mulf %46, %57 : vector<1x128xf32>
    %59 = arith.subf %42, %58 : vector<1x128xf32>
    %60 = vector.broadcast %57 : vector<1x128xf32> to vector<8x128xf32>
    %61 = arith.mulf %40, %60 : vector<8x128xf32>
    %62 = vector.broadcast %59 : vector<1x128xf32> to vector<8x128xf32>
    %63 = arith.addf %61, %62 : vector<8x128xf32>
    %cst_24 = arith.constant 0.000000e+00 : f32
    %64 = vector.broadcast %cst_24 : f32 to vector<8x128xf32>
    %65 = arith.maximumf %63, %64 : vector<8x128xf32>
    %c0_25 = arith.constant 0 : index
    %c0_26 = arith.constant 0 : index
    %66 = vector.load %arg6[%c0_25, %c0_26] : memref<128x128xbf16, #tpu.memory_space<vmem>>, vector<128x128xbf16>
    %67 = arith.extf %66 : vector<128x128xbf16> to vector<128x128xf32>
    %cst_27 = arith.constant dense<0.000000e+00> : vector<8x128xf32>
    %68 = tpu.matmul %65, %67, %cst_27 {dimension_numbers = #tpu.dot_dimension_numbers<[1], [0], [0], [1], [0, 0, 1, 1], [], []>} : vector<8x128xf32>, vector<128x128xf32>, vector<8x128xf32> -> vector<8x128xf32>
    %69 = vector.extract_strided_slice %2 {offsets = [3, 0], sizes = [1, 128], strides = [1, 1]} : vector<4x128xf32> to vector<1x128xf32>
    %70 = vector.broadcast %69 : vector<1x128xf32> to vector<8x128xf32>
    %71 = arith.addf %68, %70 : vector<8x128xf32>
    %72 = math.tanh %71 : vector<8x128xf32>
    %c0_28 = arith.constant 0 : index
    %c0_29 = arith.constant 0 : index
    %73 = vector.load %arg7[%c0_28, %c0_29] : memref<8x128xf32, #tpu.memory_space<vmem>>, vector<8x128xf32>
    tpu.vector_store %arg7[%c0_28, %c0_29], %72 {strides = array<i32>} : memref<8x128xf32, #tpu.memory_space<vmem>>, vector<8x128xf32>,
    return
  }
}

</mosaic_0001>

<bundles_post_ra>
// kernel: tpu_custom_call.1
= control target key start
LH: loop header
LB: loop body
LE: loop exit
PB: predicated region body
PF: predicated region fallthrough
CT: control target
= control target key end

     0   :  { %12 = vsyncpa [#allocation3], 0  ;;  %s3109_s0 = inlined_call_operand.hbm [shape: f32[8,32], index: 0, kind: input, shape index: {}]   ;;  %s3110_s1 = inlined_call_operand.hbm [shape: bf16[32,1024], index: 1, kind: input, shape index: {}]   ;;  %s3111_s2 = inlined_call_operand.hbm [shape: f32[2,1024], index: 2, kind: input, shape index: {}]   ;;  %s3112_s3 = inlined_call_operand.hbm [shape: bf16[1024,128], index: 3, kind: input, shape index: {}]   ;;  %s3113_s4 = inlined_call_operand.hbm [shape: bf16[128,128], index: 4, kind: input, shape index: {}]   ;;  %s3114_s5 = inlined_call_operand.vmem [shape: f32[4,128], index: 5, kind: input, shape index: {}]   ;;  %s3115_s6 = inlined_call_operand.hbm [shape: bf16[128,128], index: 6, kind: input, shape index: {}]   ;;  %s3116_s7 = inlined_call_operand.hbm [shape: f32[8,128], index: 7, kind: output, shape index: {}]  }
   0x1   :  { %13 = vsyncpa [#allocation6], 0 }
   0x2   :  { %14 = vsyncpa [#allocation9], 0 }
   0x3   :  { %15 = vsyncpa [#allocation12], 0 }
   0x4   :  { %16 = vsyncpa [#allocation4], 0  ;;  %s2746_s24 = smov [#allocation5]   ;;  %s2582_s28 = scalar_lea.hbm %s3110_s1, 2048 }
   0x5   :  { %s32_s25 = sshll.u32 %s2746_s24, 4  ;;  %p2583_p0 = scmp.ne.s32.totalorder %s3110_s1, %s2582_s28  ;;  %s33_s25 = int_to_ptr.vmem [resolvable:$true] %s32_s25 }
   0x6   :  { %p2586_p1 = scmp.lt.u32.totalorder %s2582_s28, %s3110_s1 }
   0x8   :  { %p2588_p2 = pnand %p2586_p1, %p2583_p0 }
   0xa   :  { %2591 = shalt.err (!%p2588_p2)
}
   0xb   :  { %s2592_s10 = scalar_lea.vmem %s33_s25, 2048  ;;  %p2597_p4 = scmp.lt.s32.totalorder %s33_s25, %s33_s25 }
   0xc   :  { %p2593_p3 = scmp.ne.s32.totalorder %s33_s25, %s2592_s10  ;;  %p2598_p5 = scmp.lt.s32.totalorder %s2592_s10, %s2592_s10 }
   0xe   :  { %p2599_p6 = por %p2598_p5, %p2597_p4 }
  0x10   :  { %p2600_p7 = pnand %p2599_p6, %p2593_p3 }
  0x12   :  { %2603 = shalt.err (!%p2600_p7)
}
  0x13   :  { %s2747_s11 = smov 512   ;;  %s2748_s12 = smov 32  }
  0x14   :  { %38 = dma.hbm_to_vmem [thread:$0]  %s3110_s1, 2048, %s33_s25, [#allocation6], %s2747_s11, %s2747_s11, %s2748_s12  }
  0x15   :  { %s2749_s15 = smov [#allocation8]   ;;  %s2604_s19 = scalar_lea.hbm %s3112_s3, 8192 }
  0x16   :  { %s54_s16 = sshll.u32 %s2749_s15, 4  ;;  %p2605_p8 = scmp.ne.s32.totalorder %s3112_s3, %s2604_s19  ;;  %s55_s16 = int_to_ptr.vmem [resolvable:$true] %s54_s16 }
  0x17   :  { %p2608_p9 = scmp.lt.u32.totalorder %s2604_s19, %s3112_s3 }
  0x19   :  { %p2610_p10 = pnand %p2608_p9, %p2605_p8 }
  0x1b   :  { %2613 = shalt.err (!%p2610_p10)
}
  0x1c   :  { %s2614_s24 = scalar_lea.vmem %s55_s16, 8192  ;;  %p2619_p12 = scmp.lt.s32.totalorder %s55_s16, %s55_s16 }
  0x1d   :  { %p2615_p11 = scmp.ne.s32.totalorder %s55_s16, %s2614_s24  ;;  %p2620_p13 = scmp.lt.s32.totalorder %s2614_s24, %s2614_s24 }
  0x1f   :  { %p2621_p0 = por %p2620_p13, %p2619_p12 }
  0x21   :  { %p2622_p1 = pnand %p2621_p0, %p2615_p11 }
  0x23   :  { %2625 = shalt.err (!%p2622_p1)
}
  0x24   :  { %s2750_s1 = smov 64   ;;  %s2751_s25 = smov 4  }
  0x25   :  { %60 = dma.hbm_to_vmem [thread:$0]  %s3112_s3, 8192, %s55_s16, [#allocation9], %s2750_s1, %s2750_s1, %s2751_s25  }
  0x26   :  { %s2752_s28 = smov [#allocation2]   ;;  %s2753_s30 = smov [#allocation7]  }
  0x27   :  { %s23_s29 = sshll.u32 %s2752_s28, 4  ;;  %s45_s8 = sshll.u32 %s2753_s30, 4  ;;  %s24_s29 = int_to_ptr.vmem [resolvable:$true] %s23_s29  ;;  %s46_s8 = int_to_ptr.vmem [resolvable:$true] %s45_s8 }
  0x28   :  { %s2626_s11 = scalar_lea.hbm %s3109_s0, 128 }
  0x29   :  { %p2627_p2 = scmp.ne.s32.totalorder %s3109_s0, %s2626_s11  ;;  %p2630_p3 = scmp.lt.u32.totalorder %s2626_s11, %s3109_s0 }
  0x2b   :  { %p2632_p4 = pnand %p2630_p3, %p2627_p2 }
  0x2d   :  { %2635 = shalt.err (!%p2632_p4)
}
  0x2e   :  { %s2636_s3 = scalar_lea.vmem %s24_s29, 128  ;;  %p2641_p6 = scmp.lt.s32.totalorder %s24_s29, %s24_s29 }
  0x2f   :  { %p2637_p5 = scmp.ne.s32.totalorder %s24_s29, %s2636_s3  ;;  %p2642_p7 = scmp.lt.s32.totalorder %s2636_s3, %s2636_s3 }
  0x31   :  { %p2643_p8 = por %p2642_p7, %p2641_p6 }
  0x33   :  { %p2644_p9 = pnand %p2643_p8, %p2637_p5 }
  0x35   :  { %2647 = shalt.err (!%p2644_p9)
}
  0x36   :  { %26 = dma.hbm_to_vmem [thread:$0]  %s3109_s0, 128, %s24_s29, [#allocation3]  }
  0x37   :  { %s2648_s20 = scalar_lea.hbm %s3111_s2, 256 }
  0x38   :  { %p2649_p10 = scmp.ne.s32.totalorder %s3111_s2, %s2648_s20  ;;  %p2652_p11 = scmp.lt.u32.totalorder %s2648_s20, %s3111_s2 }
  0x3a   :  { %p2654_p12 = pnand %p2652_p11, %p2649_p10 }
  0x3c   :  { %2657 = shalt.err (!%p2654_p12)
}
  0x3d   :  { %s2658_s26 = scalar_lea.vmem %s46_s8, 256  ;;  %p2663_p0 = scmp.lt.s32.totalorder %s46_s8, %s46_s8 }
  0x3e   :  { %p2659_p13 = scmp.ne.s32.totalorder %s46_s8, %s2658_s26  ;;  %p2664_p1 = scmp.lt.s32.totalorder %s2658_s26, %s2658_s26 }
  0x40   :  { %p2665_p2 = por %p2664_p1, %p2663_p0 }
  0x42   :  { %p2666_p3 = pnand %p2665_p2, %p2659_p13 }
  0x44   :  { %2669 = shalt.err (!%p2666_p3)
}
  0x45   :  { %48 = dma.hbm_to_vmem [thread:$0]  %s3111_s2, 256, %s46_s8, [#allocation6]  }
  0x46   :  { %s2754_s28 = smov [#allocation10]   ;;  %s2755_s30 = smov [#allocation11]  }
  0x47   :  { %s66_s29 = sshll.u32 %s2754_s28, 4  ;;  %s80_s9 = sshll.u32 %s2755_s30, 4  ;;  %s67_s29 = int_to_ptr.vmem [resolvable:$true] %s66_s29  ;;  %s2852_s9 = int_to_ptr.vmem [resolvable:$true] %s80_s9 }
  0x48   :  { %s2670_s12 = scalar_lea.hbm %s3113_s4, 1024 }
  0x49   :  { %p2671_p4 = scmp.ne.s32.totalorder %s3113_s4, %s2670_s12  ;;  %p2674_p5 = scmp.lt.u32.totalorder %s2670_s12, %s3113_s4 }
  0x4b   :  { %p2676_p6 = pnand %p2674_p5, %p2671_p4 }
  0x4d   :  { %2679 = shalt.err (!%p2676_p6)
}
  0x4e   :  { %s2680_s2 = scalar_lea.vmem %s67_s29, 1024  ;;  %p2685_p8 = scmp.lt.s32.totalorder %s67_s29, %s67_s29 }
  0x4f   :  { %p2681_p7 = scmp.ne.s32.totalorder %s67_s29, %s2680_s2  ;;  %p2686_p9 = scmp.lt.s32.totalorder %s2680_s2, %s2680_s2 }
  0x51   :  { %p2687_p10 = por %p2686_p9, %p2685_p8 }
  0x53   :  { %p2688_p11 = pnand %p2687_p10, %p2681_p7 }
  0x55   :  { %2691 = shalt.err (!%p2688_p11)
}
  0x56   :  { %72 = dma.hbm_to_vmem [thread:$0]  %s3113_s4, 1024, %s67_s29, [#allocation9], %s2750_s1, %s2750_s1, %s2751_s25  }
  0x57   :  { %s2692_s19 = scalar_lea.hbm %s3115_s6, 1024 }
  0x58   :  { %p2693_p12 = scmp.ne.s32.totalorder %s3115_s6, %s2692_s19  ;;  %p2696_p13 = scmp.lt.u32.totalorder %s2692_s19, %s3115_s6 }
  0x5a   :  { %p2698_p0 = pnand %p2696_p13, %p2693_p12 }
  0x5c   :  { %2701 = shalt.err (!%p2698_p0)
}
  0x5d   :  { %s2702_s24 = scalar_lea.vmem %s2852_s9, 1024  ;;  %p2707_p2 = scmp.lt.s32.totalorder %s2852_s9, %s2852_s9 }
  0x5e   :  { %p2703_p1 = scmp.ne.s32.totalorder %s2852_s9, %s2702_s24  ;;  %p2708_p3 = scmp.lt.s32.totalorder %s2702_s24, %s2702_s24 }
  0x60   :  { %p2709_p4 = por %p2708_p3, %p2707_p2 }
  0x62   :  { %p2710_p5 = pnand %p2709_p4, %p2703_p1 }
  0x64   :  { %2713 = shalt.err (!%p2710_p5)
}
  0x65   :  { %86 = dma.hbm_to_vmem [thread:$0]  %s3115_s6, 1024, %s2852_s9, [#allocation12], %s2750_s1, %s2750_s1, %s2751_s25  }
  0x66   :  { %2736 = dma.done.wait [#allocation3], 128  }
  0x67   :  { %2737 = vsyncadd [#allocation3], 4294967168 }
  0x68   :  { %2738 = dma.done.wait [#allocation6], 2304  }
  0x69   :  { %2739 = vsyncadd [#allocation6], 4294964992 }
  0x6a   :  { %2740 = dma.done.wait [#allocation9], 9216  }
  0x6b   :  { %2741 = vsyncadd [#allocation9], 4294958080 }
  0x6c   :  { %2742 = dma.done.wait [#allocation12], 1024  }
  0x6d   :  { %2743 = vsyncadd [#allocation12], 4294966272  ;;  %v2756_v0 = vmov 0.0   ;;  %v109_v1 = vld [vmem:[#allocation5] sm:$0xff]  ;;  %v110_v3 = vld [vmem:[#allocation5 + $0x8] sm:$0xff]  ;;  %vm157_vm0 = vcmask 261120  }
  0x6e   :  { %225 = vmatprep.mubr.f32.mxu0 %v2756_v0  ;;  %296 = vmatprep.mubr.f32.mxu1 %v2756_v0  ;;  %v113_v2 = vld [vmem:[#allocation5 + $0x20] sm:$0xff]  ;;  %v114_v5 = vld [vmem:[#allocation5 + $0x28] sm:$0xff]  ;;  %v111_v15 = vld [vmem:[#allocation5 + $0x10] sm:$0xff]  ;;  %vm2759_vm1 = vmmov 0  }
  0x6f   :  { %v2529_v4 = vcombine.high %v109_v1, %v113_v2  ;;  %v2530_v6 = vcombine.low %v109_v1, %v113_v2  ;;  %v117_v7 = vld [vmem:[#allocation5 + $0x40] sm:$0xff]  ;;  %v2533_v9 = vcombine.high %v110_v3, %v114_v5  ;;  %v2534_v10 = vcombine.low %v110_v3, %v114_v5  ;;  %v118_v12 = vld [vmem:[#allocation5 + $0x48] sm:$0xff]  ;;  %v115_v16 = vld [vmem:[#allocation5 + $0x30] sm:$0xff] }
  0x70   :  { %v121_v8 = vld [vmem:[#allocation5 + $0x60] sm:$0xff]  ;;  %v122_v13 = vld [vmem:[#allocation5 + $0x68] sm:$0xff]  ;;  %v112_v17 = vld [vmem:[#allocation5 + $0x18] sm:$0xff]  ;;  %v2537_v21 = vcombine.high %v111_v15, %v115_v16  ;;  %v2538_v28 = vcombine.low %v111_v15, %v115_v16  ;;  %v2757_v5 = vmov 1983009808  }
  0x71   :  { %v2531_v11 = vcombine.high %v117_v7, %v121_v8  ;;  %2322 = vmatprep.subr.bf16.mxu0 %v2529_v4  ;;  %v2535_v14 = vcombine.high %v118_v12, %v122_v13  ;;  %2330 = vmatprep.subr.bf16.mxu1 %v2533_v9  ;;  %v2532_v18 = vcombine.low %v117_v7, %v121_v8  ;;  %v116_v19 = vld [vmem:[#allocation5 + $0x38] sm:$0xff]  ;;  %v119_v23 = vld [vmem:[#allocation5 + $0x50] sm:$0xff]  ;;  %v2009_v42 = vld [vmem:[#allocation8 + $0x50] sm:$0xff]   ;;  %v610_v7 = vlaneseq }
  0x72   :  { %2324 = vmatpush1.bf16.msra.mxu0 %v2530_v6  ;;  %2332 = vmatpush1.bf16.msra.mxu1 %v2534_v10  ;;  %v2536_v20 = vcombine.low %v118_v12, %v122_v13  ;;  %v2541_v22 = vcombine.high %v112_v17, %v116_v19  ;;  %v123_v24 = vld [vmem:[#allocation5 + $0x70] sm:$0xff]  ;;  %v120_v25 = vld [vmem:[#allocation5 + $0x58] sm:$0xff]  ;;  %v2542_v29 = vcombine.low %v112_v17, %v116_v19  ;;  %v2025_v43 = vld [vmem:[#allocation8 + $0xd0] sm:$0xff]   ;;  %v608_v6 = vunpack.c.l.s4 %v2757_v5 }
  0x73   :  { %2326 = vmatprep.subr.bf16.mxu0 %v2531_v11  ;;  %2334 = vmatprep.subr.bf16.mxu1 %v2535_v14  ;;  %v124_v26 = vld [vmem:[#allocation5 + $0x78] sm:$0xff]  ;;  %v2539_v30 = vcombine.high %v119_v23, %v123_v24  ;;  %v2540_v32 = vcombine.low %v119_v23, %v123_v24  ;;  %v2007_v34 = vld [vmem:[#allocation8 + $0x40] sm:$0xff]   ;;  %v2001_v44 = vld [vmem:[#allocation8 + $0x10] sm:$0xff]   ;;  %v2897_v9 = vshrl.u32 %v610_v7, 7 }
  0x74   :  { %v105_v27 = vld [vmem:[#allocation2] sm:$0xff]  ;;  %v2543_v31 = vcombine.high %v120_v25, %v124_v26  ;;  %v2544_v33 = vcombine.low %v120_v25, %v124_v26  ;;  %v2023_v35 = vld [vmem:[#allocation8 + $0xc0] sm:$0xff]   ;;  %v2017_v45 = vld [vmem:[#allocation8 + $0x90] sm:$0xff]   ;;  %v609_v8 = vunpack.c.0.s8 %v608_v6 }
  0x75   :  { %v1681_v36 = vld [vmem:[#allocation8] sm:$0xff]   ;;  %v2008_v38 = vld [vmem:[#allocation8 + $0x48] sm:$0xff]   ;;  %v2010_v46 = vld [vmem:[#allocation8 + $0x58] sm:$0xff]  }
  0x76   :  { %2328 = vmatpush1.bf16.msra.mxu0 %v2532_v18  ;;  %2336 = vmatpush1.bf16.msra.mxu1 %v2536_v20  ;;  %v2015_v37 = vld [vmem:[#allocation8 + $0x80] sm:$0xff]   ;;  %v2024_v39 = vld [vmem:[#allocation8 + $0xc8] sm:$0xff]   ;;  %v2026_v47 = vld [vmem:[#allocation8 + $0xd8] sm:$0xff]   ;;  %v2909_v15 = vsub.s32 %v609_v8, %v2897_v9 }
  0x77   :  { %2338 = vmatprep.subr.bf16.mxu0 %v2537_v21  ;;  %2346 = vmatprep.subr.bf16.mxu1 %v2541_v22  ;;  %v2000_v40 = vld [vmem:[#allocation8 + $0x8] sm:$0xff]   ;;  %v2002_v48 = vld [vmem:[#allocation8 + $0x18] sm:$0xff]   ;;  %v2011_v50 = vld [vmem:[#allocation8 + $0x60] sm:$0xff]  }
  0x78   :  { %v2016_v41 = vld [vmem:[#allocation8 + $0x88] sm:$0xff]   ;;  %v2018_v49 = vld [vmem:[#allocation8 + $0x98] sm:$0xff]   ;;  %v2027_v51 = vld [vmem:[#allocation8 + $0xe0] sm:$0xff]  }
  0x79   :  { %1676 = vmatmul.mubr.msk.f32.vlgmr.msra.gmra.mrb[0].mxu0 %vm157_vm0, %v105_v27  ;;  %1677 = vmatmul.mubr.msk.f32.vlgmr.msra.gmra.mrb[0].mxu1 %vm157_vm0, %v105_v27  ;;  %v2003_v52 = vld [vmem:[#allocation8 + $0x20] sm:$0xff]   ;;  %v2012_v54 = vld [vmem:[#allocation8 + $0x68] sm:$0xff]   ;;  %v2013_v58 = vld [vmem:[#allocation8 + $0x70] sm:$0xff]  }
  0x7a   :  { %2340 = vmatpush1.bf16.msra.mxu0 %v2538_v28  ;;  %2348 = vmatpush1.bf16.msra.mxu1 %v2542_v29  ;;  %v2019_v53 = vld [vmem:[#allocation8 + $0xa0] sm:$0xff]   ;;  %v2028_v55 = vld [vmem:[#allocation8 + $0xe8] sm:$0xff]   ;;  %v2029_v59 = vld [vmem:[#allocation8 + $0xf0] sm:$0xff]  }
  0x7b   :  { %2342 = vmatprep.subr.bf16.mxu0 %v2539_v30  ;;  %2350 = vmatprep.subr.bf16.mxu1 %v2543_v31  ;;  %v2004_v56 = vld [vmem:[#allocation8 + $0x28] sm:$0xff]   ;;  %v2005_v60 = vld [vmem:[#allocation8 + $0x30] sm:$0xff]   ;;  %v2014_v62 = vld [vmem:[#allocation8 + $0x78] sm:$0xff]  }
  0x7c   :  { %367 = vmatprep.mubr.f32.mxu0 %v2756_v0  ;;  %438 = vmatprep.mubr.f32.mxu1 %v2756_v0  ;;  %v2020_v57 = vld [vmem:[#allocation8 + $0xa8] sm:$0xff]   ;;  %v2021_v61 = vld [vmem:[#allocation8 + $0xb0] sm:$0xff]   ;;  %v2030_v63 = vld [vmem:[#allocation8 + $0xf8] sm:$0xff]  }
  0x7d   :  { %v2006_v1 = vld [vmem:[#allocation8 + $0x38] sm:$0xff]   ;;  %v2039_v3 = vld [vmem:[#allocation8 + $0x140] sm:$0xff]  }
  0x7e   :  { %2344 = vmatpush1.bf16.msra.mxu0 %v2540_v32  ;;  %2352 = vmatpush1.bf16.msra.mxu1 %v2544_v33  ;;  %v2022_v2 = vld [vmem:[#allocation8 + $0xb8] sm:$0xff]   ;;  %v2055_v4 = vld [vmem:[#allocation8 + $0x1c0] sm:$0xff]  }
  0x7f   :  { %2354 = vmatprep.subr.bf16.mxu0 %v2007_v34  ;;  %2386 = vmatprep.subr.bf16.mxu1 %v2023_v35 }
  0x81   :  { %1678 = vmatmul.mubr.msk.f32.vlgmr.msra.gmra.mrb[2].mxu0 %vm157_vm0, %v105_v27  ;;  %1679 = vmatmul.mubr.msk.f32.vlgmr.msra.gmra.mrb[2].mxu1 %vm157_vm0, %v105_v27 }
  0x82   :  { %2356 = vmatpush3.bf16.msra.mxu0 %v1681_v36  ;;  %2388 = vmatpush3.bf16.msra.mxu1 %v2015_v37 }
  0x83   :  { %2358 = vmatprep.subr.bf16.mxu0 %v2008_v38  ;;  %2390 = vmatprep.subr.bf16.mxu1 %v2024_v39 }
  0x86   :  { %2360 = vmatpush3.bf16.msra.mxu0 %v2000_v40  ;;  %2392 = vmatpush3.bf16.msra.mxu1 %v2016_v41 }
  0x87   :  { %2362 = vmatprep.subr.bf16.mxu0 %v2009_v42  ;;  %2394 = vmatprep.subr.bf16.mxu1 %v2025_v43 }
  0x8a   :  { %2364 = vmatpush3.bf16.msra.mxu0 %v2001_v44  ;;  %2396 = vmatpush3.bf16.msra.mxu1 %v2017_v45 }
  0x8b   :  { %2366 = vmatprep.subr.bf16.mxu0 %v2010_v46  ;;  %2398 = vmatprep.subr.bf16.mxu1 %v2026_v47 }
  0x8e   :  { %2368 = vmatpush3.bf16.msra.mxu0 %v2002_v48  ;;  %2400 = vmatpush3.bf16.msra.mxu1 %v2018_v49 }
  0x8f   :  { %2370 = vmatprep.subr.bf16.mxu0 %v2011_v50  ;;  %2402 = vmatprep.subr.bf16.mxu1 %v2027_v51 }
  0x92   :  { %2372 = vmatpush3.bf16.msra.mxu0 %v2003_v52  ;;  %2404 = vmatpush3.bf16.msra.mxu1 %v2019_v53 }
  0x93   :  { %2374 = vmatprep.subr.bf16.mxu0 %v2012_v54  ;;  %2406 = vmatprep.subr.bf16.mxu1 %v2028_v55 }
  0x96   :  { %2376 = vmatpush3.bf16.msra.mxu0 %v2004_v56  ;;  %2408 = vmatpush3.bf16.msra.mxu1 %v2020_v57 }
  0x97   :  { %2378 = vmatprep.subr.bf16.mxu0 %v2013_v58  ;;  %2410 = vmatprep.subr.bf16.mxu1 %v2029_v59 }
  0x9a   :  { %2380 = vmatpush3.bf16.msra.mxu0 %v2005_v60  ;;  %2412 = vmatpush3.bf16.msra.mxu1 %v2021_v61 }
  0x9b   :  { %2382 = vmatprep.subr.bf16.mxu0 %v2014_v62  ;;  %2414 = vmatprep.subr.bf16.mxu1 %v2030_v63 }
  0x9e   :  { %2384 = vmatpush3.bf16.msra.mxu0 %v2006_v1  ;;  %2416 = vmatpush3.bf16.msra.mxu1 %v2022_v2 }
  0x9f   :  { %2418 = vmatprep.subr.bf16.mxu0 %v2039_v3  ;;  %2450 = vmatprep.subr.bf16.mxu1 %v2055_v4 }
 0x14c   :  { %v2899_v10 = vpop.f32.mrb[0].mxu0  ;;  %v2904_v13 = vpop.f32.mrb[0].mxu1 }
 0x14d   :  { %v445_v11 = vrot.slane %v2899_v10, 4  ;;  %v501_v12 = vmul.f32 %v2899_v10, %v2899_v10  ;;  %v2906_v14 = vpop.f32.mrb[1].mxu0  ;;  %v457_v16 = vrot.slane %v2904_v13, 4  ;;  %v503_v17 = vmul.f32 %v2904_v13, %v2904_v13  ;;  %v2917_v20 = vpop.f32.mrb[1].mxu1 }
 0x14e   :  { %v451_v18 = vrot.slane %v2906_v14, 4  ;;  %v502_v19 = vmul.f32 %v2906_v14, %v2906_v14  ;;  %v463_v23 = vrot.slane %v2917_v20, 4  ;;  %v504_v24 = vmul.f32 %v2917_v20, %v2917_v20 }
 0x14f   :  { %v446_v21 = vadd.f32 %v445_v11, %v2899_v10  ;;  %v509_v22 = vrot.slane %v501_v12, 4  ;;  %v458_v25 = vadd.f32 %v457_v16, %v2904_v13  ;;  %v521_v26 = vrot.slane %v503_v17, 4 }
 0x150   :  { %v452_v27 = vadd.f32 %v451_v18, %v2906_v14  ;;  %v515_v28 = vrot.slane %v502_v19, 4  ;;  %v464_v31 = vadd.f32 %v463_v23, %v2917_v20  ;;  %v527_v32 = vrot.slane %v504_v24, 4 }
 0x151   :  { %v447_v29 = vrot.slane %v446_v21, 2  ;;  %v510_v30 = vadd.f32 %v509_v22, %v501_v12  ;;  %v459_v33 = vrot.slane %v458_v25, 2  ;;  %v522_v34 = vadd.f32 %v521_v26, %v503_v17 }
 0x152   :  { %v453_v35 = vrot.slane %v452_v27, 2  ;;  %v516_v36 = vadd.f32 %v515_v28, %v502_v19  ;;  %v465_v39 = vrot.slane %v464_v31, 2  ;;  %v528_v40 = vadd.f32 %v527_v32, %v504_v24 }
 0x153   :  { %v448_v37 = vadd.f32 %v447_v29, %v446_v21  ;;  %v511_v38 = vrot.slane %v510_v30, 2  ;;  %v460_v41 = vadd.f32 %v459_v33, %v458_v25  ;;  %v523_v42 = vrot.slane %v522_v34, 2 }
 0x154   :  { %v454_v43 = vadd.f32 %v453_v35, %v452_v27  ;;  %v517_v44 = vrot.slane %v516_v36, 2  ;;  %v2926_v45 = vpop.f32.mrb[2].mxu0  ;;  %v466_v48 = vadd.f32 %v465_v39, %v464_v31  ;;  %v529_v49 = vrot.slane %v528_v40, 2  ;;  %v2928_v50 = vpop.f32.mrb[2].mxu1 }
 0x155   :  { %v449_v46 = vrot.slane %v448_v37, 1  ;;  %v512_v47 = vadd.f32 %v511_v38, %v510_v30  ;;  %v2930_v51 = vpop.f32.mrb[3].mxu0  ;;  %v461_v52 = vrot.slane %v460_v41, 1  ;;  %v524_v53 = vadd.f32 %v523_v42, %v522_v34  ;;  %v2932_v56 = vpop.f32.mrb[3].mxu1 }
 0x156   :  { %v455_v54 = vrot.slane %v454_v43, 1  ;;  %v518_v55 = vadd.f32 %v517_v44, %v516_v36  ;;  %v467_v59 = vrot.slane %v466_v48, 1  ;;  %v530_v60 = vadd.f32 %v529_v49, %v528_v40 }
 0x157   :  { %v450_v57 = vadd.f32 %v449_v46, %v448_v37  ;;  %v513_v58 = vrot.slane %v512_v47, 1  ;;  %v462_v61 = vadd.f32 %v461_v52, %v460_v41  ;;  %v525_v62 = vrot.slane %v524_v53, 1 }
 0x158   :  { %v456_v63 = vadd.f32 %v455_v54, %v454_v43  ;;  %v519_v1 = vrot.slane %v518_v55, 1  ;;  %v468_v4 = vadd.f32 %v467_v59, %v466_v48  ;;  %v531_v5 = vrot.slane %v530_v60, 1 }
 0x159   :  { %v2934_v2 = vmul.f32 0.125, %v450_v57  ;;  %v514_v3 = vadd.f32 %v513_v58, %v512_v47  ;;  %v2936_v6 = vmul.f32 0.125, %v462_v61  ;;  %v526_v7 = vadd.f32 %v525_v62, %v524_v53 }
 0x15a   :  { %v2938_v8 = vmul.f32 0.125, %v456_v63  ;;  %v520_v11 = vadd.f32 %v519_v1, %v518_v55  ;;  %v2942_v17 = vmul.f32 0.125, %v468_v4  ;;  %v532_v18 = vadd.f32 %v531_v5, %v530_v60 }
 0x15b   :  { %v557_v12 = vmul.f32 0.125, %v514_v3  ;;  %v565_v16 = vmul.f32 %v2934_v2, %v2934_v2  ;;  %v559_v19 = vmul.f32 0.125, %v526_v7  ;;  %v567_v21 = vmul.f32 %v2936_v6, %v2936_v6 }
 0x15c   :  { %v558_v22 = vmul.f32 0.125, %v520_v11  ;;  %v566_v23 = vmul.f32 %v2938_v8, %v2938_v8  ;;  %v560_v25 = vmul.f32 0.125, %v532_v18  ;;  %v568_v26 = vmul.f32 %v2942_v17, %v2942_v17 }
 0x15d   :  { %v573_v24 = vsub.f32 %v557_v12, %v565_v16  ;;  %v469_v27 = vrot.slane %v2926_v45, 4  ;;  %v575_v28 = vsub.f32 %v559_v19, %v567_v21  ;;  %v505_v30 = vmul.f32 %v2926_v45, %v2926_v45 }
 0x15e   :  { %v574_v29 = vsub.f32 %v558_v22, %v566_v23  ;;  %v481_v31 = vrot.slane %v2928_v50, 4  ;;  %v576_v33 = vsub.f32 %v560_v25, %v568_v26  ;;  %v507_v35 = vmul.f32 %v2928_v50, %v2928_v50 }
 0x15f   :  { %v581_v32 = vadd.f32 1e-05, %v573_v24  ;;  %v470_v34 = vadd.f32 %v469_v27, %v2926_v45  ;;  %v583_v36 = vadd.f32 1e-05, %v575_v28  ;;  %v533_v38 = vrot.slane %v505_v30, 4 }
 0x160   :  { %v582_v37 = vadd.f32 1e-05, %v574_v29  ;;  %v482_v39 = vadd.f32 %v481_v31, %v2928_v50  ;;  %v584_v40 = vadd.f32 1e-05, %v576_v33  ;;  %v545_v42 = vrot.slane %v507_v35, 4 }
 0x161   :  { %2560 = vrsqrt.f32 %v581_v32  ;;  %v471_v41 = vrot.slane %v470_v34, 2  ;;  %v534_v43 = vadd.f32 %v533_v38, %v505_v30  ;;  %v475_v46 = vrot.slane %v2930_v51, 4 }
 0x162   :  { %2562 = vrsqrt.f32 %v583_v36  ;;  %v483_v44 = vrot.slane %v482_v39, 2  ;;  %v546_v48 = vadd.f32 %v545_v42, %v507_v35  ;;  %v506_v49 = vmul.f32 %v2930_v51, %v2930_v51 }
 0x163   :  { %2564 = vrsqrt.f32 %v582_v37  ;;  %v472_v47 = vadd.f32 %v471_v41, %v470_v34  ;;  %v535_v52 = vrot.slane %v534_v43, 2  ;;  %v476_v54 = vadd.f32 %v475_v46, %v2930_v51 }
 0x164   :  { %2566 = vrsqrt.f32 %v584_v40  ;;  %v484_v53 = vadd.f32 %v483_v44, %v482_v39  ;;  %v547_v57 = vrot.slane %v546_v48, 2  ;;  %v539_v58 = vrot.slane %v506_v49, 4 }
 0x165   :  { %v473_v55 = vrot.slane %v472_v47, 1  ;;  %v487_v59 = vrot.slane %v2932_v56, 4  ;;  %v536_v60 = vadd.f32 %v535_v52, %v534_v43  ;;  %v477_v62 = vrot.slane %v476_v54, 2 }
 0x166   :  { %v485_v61 = vrot.slane %v484_v53, 1  ;;  %v508_v63 = vmul.f32 %v2932_v56, %v2932_v56  ;;  %v548_v3 = vadd.f32 %v547_v57, %v546_v48  ;;  %v540_v4 = vadd.f32 %v539_v58, %v506_v49 }
 0x167   :  { %v474_v1 = vadd.f32 %v473_v55, %v472_v47  ;;  %v488_v5 = vadd.f32 %v487_v59, %v2932_v56  ;;  %v537_v7 = vrot.slane %v536_v60, 1  ;;  %v478_v12 = vadd.f32 %v477_v62, %v476_v54 }
 0x168   :  { %v486_v11 = vadd.f32 %v485_v61, %v484_v53  ;;  %v551_v16 = vrot.slane %v508_v63, 4  ;;  %v549_v19 = vrot.slane %v548_v3, 1  ;;  %v541_v21 = vrot.slane %v540_v4, 2  ;;  %v106_v61 = vld [vmem:[#allocation7] sm:$0xff] }
 0x169   :  { %v2966_v18 = vmul.f32 0.125, %v474_v1  ;;  %v489_v22 = vrot.slane %v488_v5, 2  ;;  %v538_v23 = vadd.f32 %v537_v7, %v536_v60  ;;  %v479_v25 = vrot.slane %v478_v12, 1 }
 0x16a   :  { %v2968_v24 = vmul.f32 0.125, %v486_v11  ;;  %v552_v26 = vadd.f32 %v551_v16, %v508_v63  ;;  %v550_v29 = vadd.f32 %v549_v19, %v548_v3  ;;  %v542_v30 = vadd.f32 %v541_v21, %v540_v4 }
 0x16b   :  { %v2561_v27 = vpop.eup %2560  ;;  %v569_v28 = vmul.f32 %v2966_v18, %v2966_v18  ;;  %v490_v31 = vadd.f32 %v489_v22, %v488_v5  ;;  %v561_v33 = vmul.f32 0.125, %v538_v23  ;;  %v480_v35 = vadd.f32 %v479_v25, %v478_v12 }
 0x16c   :  { %v2563_v32 = vpop.eup %2562  ;;  %v571_v34 = vmul.f32 %v2968_v24, %v2968_v24  ;;  %v553_v36 = vrot.slane %v552_v26, 2  ;;  %v563_v38 = vmul.f32 0.125, %v550_v29  ;;  %v543_v39 = vrot.slane %v542_v30, 1 }
 0x16d   :  { %v2565_v37 = vpop.eup %2564  ;;  %v491_v40 = vrot.slane %v490_v31, 1  ;;  %v577_v43 = vsub.f32 %v561_v33, %v569_v28  ;;  %v2974_v44 = vmul.f32 0.125, %v480_v35  ;;  %v2983_v62 = vsub.s32 0, %v2897_v9 }
 0x16e   :  { %v2567_v41 = vpop.eup %2566  ;;  %v605_v42 = vcombine.low %v2561_v27, %v2565_v37  ;;  %v554_v46 = vadd.f32 %v553_v36, %v552_v26  ;;  %v544_v48 = vadd.f32 %v543_v39, %v542_v30  ;;  %v579_v53 = vsub.f32 %v563_v38, %v571_v34 }
 0x16f   :  { %v606_v47 = vcombine.low %v2563_v32, %v2567_v41  ;;  %v492_v49 = vadd.f32 %v491_v40, %v490_v31  ;;  %v570_v54 = vmul.f32 %v2974_v44, %v2974_v44  ;;  %v585_v58 = vadd.f32 1e-05, %v577_v43 }
 0x170   :  { %v613_v52 = vrot.slane %v605_v42, %v2909_v15  ;;  %v555_v55 = vrot.slane %v554_v46, 1  ;;  %v562_v59 = vmul.f32 0.125, %v544_v48  ;;  %v655_v63 = vsub.s32 4, %v2897_v9 }
 0x171   :  { %v620_v57 = vrot.slane %v606_v47, %v2909_v15  ;;  %v2980_v60 = vmul.f32 0.125, %v492_v49  ;;  %v659_v4 = vsub.s32 6, %v2897_v9  ;;  %v587_v11 = vadd.f32 1e-05, %v579_v53 }
 0x172   :  { %v556_v1 = vadd.f32 %v555_v55, %v554_v46  ;;  %v578_v5 = vsub.f32 %v562_v59, %v570_v54  ;;  %v2990_v16 = vsub.s32 2, %v2897_v9  ;;  %2568 = vrsqrt.f32 %v585_v58 }
 0x173   :  { %v621_v3 = vcombine.low %v613_v52, %v620_v57  ;;  %v572_v7 = vmul.f32 %v2980_v60, %v2980_v60  ;;  %v3013_v46 = vsub.s32 1, %v2897_v9  ;;  %v793_v49 = vsub.s32 5, %v2897_v9 }
 0x174   :  { %v564_v12 = vmul.f32 0.125, %v556_v1  ;;  %v586_v21 = vadd.f32 1e-05, %v578_v5 }
 0x175   :  { %v641_v19 = vmul.f32 %v621_v3, %v106_v61  ;;  %v3028_v3 = vld [vmem:[#allocation7 + $0x8] sm:$0xff] }
 0x176   :  { %v580_v22 = vsub.f32 %v564_v12, %v572_v7  ;;  %2570 = vrsqrt.f32 %v586_v21 }
 0x177   :  { %v656_v23 = vrot.slane %v641_v19, %v655_v63  ;;  %v660_v25 = vrot.slane %v641_v19, %v659_v4  ;;  %v648_v26 = vrot.slane %v641_v19, %v2983_v62  ;;  %2572 = vrsqrt.f32 %v587_v11 }
 0x178   :  { %v588_v27 = vadd.f32 1e-05, %v580_v22  ;;  %v652_v28 = vrot.slane %v641_v19, %v2990_v16 }
 0x179   :  { %v687_v29 = vmul.f32 %v656_v23, %v2936_v6  ;;  %v688_v30 = vmul.f32 %v660_v25, %v2942_v17  ;;  %v756_v31 = vrot.slane %v660_v25, %v2983_v62  ;;  %v685_v32 = vmul.f32 %v648_v26, %v2934_v2 }
 0x17a   :  { %2574 = vrsqrt.f32 %v588_v27  ;;  %v686_v33 = vmul.f32 %v652_v28, %v2938_v8  ;;  %v748_v34 = vrot.slane %v652_v28, %v2983_v62  ;;  %v744_v35 = vrot.slane %v648_v26, %v2983_v62 }
 0x17b   :  { %v702_v36 = vcombine.low %v687_v29, %v688_v30  ;;  %v776_v37 = vmul.f32 %v756_v31, %v2917_v20  ;;  %v752_v38 = vrot.slane %v656_v23, %v2983_v62  ;;  %v3016_v20 = vsub.s32 3, %v2897_v9 }
 0x17c   :  { %v701_v39 = vcombine.low %v685_v32, %v686_v33  ;;  %v774_v6 = vmul.f32 %v748_v34, %v2906_v14  ;;  %v773_v17 = vmul.f32 %v744_v35, %v2899_v10  ;;  %v2569_v41 = vpop.eup %2568  ;;  %v797_v10 = vsub.s32 7, %v2897_v9  ;;  %v2031_v32 = vld [vmem:[#allocation8 + $0x100] sm:$0xff]  }
 0x17d   :  { %v716_v40 = vrot.slane %v702_v36, %v2909_v15  ;;  %v775_v2 = vmul.f32 %v752_v38, %v2904_v13  ;;  %v2047_v33 = vld [vmem:[#allocation8 + $0x180] sm:$0xff]   ;;  %v2040_v36 = vld [vmem:[#allocation8 + $0x148] sm:$0xff]  }
 0x17e   :  { %v709_v8 = vrot.slane %v701_v39, %v2909_v15 }
 0x180   :  { %v717_v42 = vcombine.low %v709_v8, %v716_v40  ;;  %v2571_v43 = vpop.eup %2570  ;;  %v2048_v8 = vld [vmem:[#allocation8 + $0x188] sm:$0xff]  }
 0x181   :  { %v2573_v47 = vpop.eup %2572  ;;  %v622_v48 = vcombine.low %v2569_v41, %v2571_v43  ;;  %v2041_v41 = vld [vmem:[#allocation8 + $0x150] sm:$0xff]  }
 0x182   :  { %v735_v14 = vrot.slane %v717_v42, 7 }
 0x183   :  { %v630_v54 = vrot.slane %v622_v48, %v2909_v15 }
 0x184   :  { %v2575_v52 = vpop.eup %2574  ;;  %v739_v13 = vsub.f32 %v106_v61, %v735_v14 }
 0x185   :  { %v623_v53 = vcombine.low %v2573_v47, %v2575_v52  ;;  %v2057_v47 = vld [vmem:[#allocation8 + $0x1d0] sm:$0xff]  }
 0x186   :  { %v790_v55 = vrot.slane %v739_v13, %v3016_v20  ;;  %v798_v57 = vrot.slane %v739_v13, %v797_v10  ;;  %v786_v58 = vrot.slane %v739_v13, %v3013_v46  ;;  %v794_v59 = vrot.slane %v739_v13, %v793_v49  ;;  %v2033_v52 = vld [vmem:[#allocation8 + $0x110] sm:$0xff]  }
 0x187   :  { %v637_v1 = vrot.slane %v623_v53, %v2909_v15  ;;  %v2049_v13 = vld [vmem:[#allocation8 + $0x190] sm:$0xff]  }
 0x188   :  { %v830_v5 = vrot.slane %v790_v55, %v3013_v46  ;;  %v838_v61 = vrot.slane %v798_v57, %v3013_v46  ;;  %v826_v7 = vrot.slane %v786_v58, %v3013_v46  ;;  %v834_v11 = vrot.slane %v794_v59, %v3013_v46  ;;  %v2034_v57 = vld [vmem:[#allocation8 + $0x118] sm:$0xff]   ;;  %v2043_v59 = vld [vmem:[#allocation8 + $0x160] sm:$0xff]  }
 0x189   :  { %v638_v12 = vcombine.low %v630_v54, %v637_v1  ;;  %v2042_v54 = vld [vmem:[#allocation8 + $0x158] sm:$0xff]  }
 0x18a   :  { %v856_v19 = vadd.f32 %v830_v5, %v774_v6  ;;  %v858_v21 = vadd.f32 %v838_v61, %v776_v37  ;;  %v855_v22 = vadd.f32 %v826_v7, %v773_v17  ;;  %v857_v23 = vadd.f32 %v834_v11, %v775_v2  ;;  %v2056_v37 = vld [vmem:[#allocation8 + $0x1c8] sm:$0xff]   ;;  %v2035_v61 = vld [vmem:[#allocation8 + $0x120] sm:$0xff]  }
 0x18b   :  { %v642_v25 = vmul.f32 %v638_v12, %v3028_v3  ;;  %v2051_v7 = vld [vmem:[#allocation8 + $0x1a0] sm:$0xff]  }
 0x18c   :  { %v864_v26 = vmax.f32 %v856_v19, 0.0  ;;  %v866_v27 = vmax.f32 %v858_v21, 0.0  ;;  %v863_v28 = vmax.f32 %v855_v22, 0.0  ;;  %v865_v29 = vmax.f32 %v857_v23, 0.0  ;;  %v2044_v19 = vld [vmem:[#allocation8 + $0x168] sm:$0xff]  }
 0x18d   :  { %v672_v30 = vrot.slane %v642_v25, %v655_v63  ;;  %v676_v31 = vrot.slane %v642_v25, %v659_v4  ;;  %v664_v34 = vrot.slane %v642_v25, %v2983_v62  ;;  %v668_v35 = vrot.slane %v642_v25, %v2990_v16  ;;  %v2060_v21 = vld [vmem:[#allocation8 + $0x1e8] sm:$0xff]  }
 0x18e   :  { %1195 = vmatprep.mubr.f32.mxu0 %v864_v26  ;;  %1265 = vmatprep.mubr.f32.mxu1 %v866_v27 }
 0x18f   :  { %v691_v38 = vmul.f32 %v672_v30, %v2968_v24  ;;  %v692_v39 = vmul.f32 %v676_v31, %v2980_v60  ;;  %v772_v6 = vrot.slane %v676_v31, %v2983_v62  ;;  %1196 = vmatmul.mubr.f32.vlgmr.msra.gmra.mrb[4].mxu0 %v863_v28  ;;  %1266 = vmatmul.mubr.f32.vlgmr.msra.gmra.mrb[4].mxu1 %v865_v29  ;;  %v2032_v24 = vld [vmem:[#allocation8 + $0x108] sm:$0xff]   ;;  %v2061_v31 = vld [vmem:[#allocation8 + $0x1f0] sm:$0xff]  }
 0x190   :  { %2420 = vmatpush3.bf16.msra.mxu0 %v2031_v32  ;;  %2452 = vmatpush3.bf16.msra.mxu1 %v2047_v33  ;;  %v689_v63 = vmul.f32 %v664_v34, %v2966_v18  ;;  %v690_v4 = vmul.f32 %v668_v35, %v2974_v44  ;;  %v764_v17 = vrot.slane %v668_v35, %v2983_v62  ;;  %v2036_v28 = vld [vmem:[#allocation8 + $0x128] sm:$0xff]   ;;  %v2037_v32 = vld [vmem:[#allocation8 + $0x130] sm:$0xff]   ;;  %v2062_v35 = vld [vmem:[#allocation8 + $0x1f8] sm:$0xff]  }
 0x191   :  { %v719_v40 = vcombine.low %v691_v38, %v692_v39  ;;  %v780_v2 = vmul.f32 %v772_v6, %v2932_v56  ;;  %2422 = vmatprep.subr.bf16.mxu0 %v2040_v36  ;;  %2454 = vmatprep.subr.bf16.mxu1 %v2056_v37  ;;  %v760_v60 = vrot.slane %v664_v34, %v2983_v62  ;;  %v2052_v29 = vld [vmem:[#allocation8 + $0x1a8] sm:$0xff]   ;;  %v2053_v33 = vld [vmem:[#allocation8 + $0x1b0] sm:$0xff]   ;;  %v2046_v34 = vld [vmem:[#allocation8 + $0x178] sm:$0xff]  }
 0x192   :  { %v718_v42 = vcombine.low %v689_v63, %v690_v4  ;;  %v778_v43 = vmul.f32 %v764_v17, %v2930_v51  ;;  %v768_v18 = vrot.slane %v672_v30, %v2983_v62  ;;  %v2058_v51 = vld [vmem:[#allocation8 + $0x1d8] sm:$0xff]   ;;  %v2045_v30 = vld [vmem:[#allocation8 + $0x170] sm:$0xff]   ;;  %v1937_v6 = vld [vmem:[#allocation10] sm:$0xff]   ;;  %v2758_v63 = vmov 0.0|0.0  }
 0x193   :  { %v733_v44 = vrot.slane %v719_v40, %v2909_v15  ;;  %v777_v48 = vmul.f32 %v760_v60, %v2926_v45  ;;  %v2050_v45 = vld [vmem:[#allocation8 + $0x198] sm:$0xff]   ;;  %v2063_v4 = vld [vmem:[#allocation10 + $0x8] sm:$0xff]   ;;  %v2064_v17 = vld [vmem:[#allocation10 + $0x10] sm:$0xff]  }
 0x194   :  { %2424 = vmatpush3.bf16.msra.mxu0 %v2032_v24  ;;  %2456 = vmatpush3.bf16.msra.mxu1 %v2048_v8  ;;  %v726_v56 = vrot.slane %v718_v42, %v2909_v15  ;;  %v779_v14 = vmul.f32 %v768_v18, %v2928_v50  ;;  %v2059_v15 = vld [vmem:[#allocation8 + $0x1e0] sm:$0xff]   ;;  %v2038_v36 = vld [vmem:[#allocation8 + $0x138] sm:$0xff]   ;;  %v2067_v24 = vld [vmem:[#allocation10 + $0x28] sm:$0xff]  }
 0x195   :  { %2426 = vmatprep.subr.bf16.mxu0 %v2041_v41  ;;  %2458 = vmatprep.subr.bf16.mxu1 %v2057_v47  ;;  %v2054_v37 = vld [vmem:[#allocation8 + $0x1b8] sm:$0xff]   ;;  %v2068_v8 = vld [vmem:[#allocation10 + $0x30] sm:$0xff]   ;;  %v3080_v41 = vld [vmem:[%s3114_s5] sm:$0xf]  ;;  %s2760_s5 = smov [#allocation13]  }
 0x196   :  { %v734_v53 = vcombine.low %v726_v56, %v733_v44  ;;  %v2065_v40 = vld [vmem:[#allocation10 + $0x18] sm:$0xff]   ;;  %v1130_v47 = vrot.slane %v3080_v41, %v2983_v62  ;;  %v2070_v62 = vld [vmem:[#allocation11 + $0x8] sm:$0xff]   ;;  %s1664_s25 = sshll.u32 %s2760_s5, 4  ;;  %s1665_s25 = int_to_ptr.vmem [resolvable:$true] %s1664_s25 }
 0x197   :  { %v2069_v60 = vld [vmem:[#allocation10 + $0x38] sm:$0xff]   ;;  %s2714_s0 = scalar_lea.vmem %s1665_s25, 128  ;;  %p2719_p7 = scmp.lt.s32.totalorder %s1665_s25, %s1665_s25 }
 0x198   :  { %v736_v55 = vrot.slane %v734_v53, 7  ;;  %2428 = vmatpush3.bf16.msra.mxu0 %v2033_v52  ;;  %2460 = vmatpush3.bf16.msra.mxu1 %v2049_v13  ;;  %p2715_p6 = scmp.ne.s32.totalorder %s1665_s25, %s2714_s0  ;;  %p2720_p8 = scmp.lt.s32.totalorder %s2714_s0, %s2714_s0 }
 0x199   :  { %2430 = vmatprep.subr.bf16.mxu0 %v2042_v54  ;;  %2462 = vmatprep.subr.bf16.mxu1 %v2058_v51 }
 0x19a   :  { %v740_v58 = vsub.f32 %v3028_v3, %v736_v55  ;;  %p2721_p9 = por %p2720_p8, %p2719_p7 }
 0x19c   :  { %v806_v50 = vrot.slane %v740_v58, %v3016_v20  ;;  %v814_v1 = vrot.slane %v740_v58, %v797_v10  ;;  %2432 = vmatpush3.bf16.msra.mxu0 %v2034_v57  ;;  %2464 = vmatpush3.bf16.msra.mxu1 %v2050_v45  ;;  %v802_v5 = vrot.slane %v740_v58, %v3013_v46  ;;  %p2722_p10 = pnand %p2721_p9, %p2715_p6 }
 0x19d   :  { %2434 = vmatprep.subr.bf16.mxu0 %v2043_v59  ;;  %2466 = vmatprep.subr.bf16.mxu1 %v2059_v15  ;;  %v810_v11 = vrot.slane %v740_v58, %v793_v49  ;;  %v1969_v59 = vld [vmem:[#allocation11] sm:$0xff]   ;;  %v2071_v15 = vld [vmem:[#allocation11 + $0x10] sm:$0xff]  }
 0x19e   :  { %v846_v3 = vrot.slane %v806_v50, %v3013_v46  ;;  %v854_v12 = vrot.slane %v814_v1, %v3013_v46  ;;  %v842_v22 = vrot.slane %v802_v5, %v3013_v46  ;;  %v2072_v50 = vld [vmem:[#allocation11 + $0x18] sm:$0xff]   ;;  %v2073_v1 = vld [vmem:[#allocation11 + $0x20] sm:$0xff]   ;;  %v2074_v5 = vld [vmem:[#allocation11 + $0x28] sm:$0xff]  }
 0x19f   :  { %v850_v10 = vrot.slane %v810_v11, %v3013_v46 }
 0x1a0   :  { %v860_v23 = vadd.f32 %v846_v3, %v778_v43  ;;  %v862_v25 = vadd.f32 %v854_v12, %v780_v2  ;;  %2436 = vmatpush3.bf16.msra.mxu0 %v2035_v61  ;;  %2468 = vmatpush3.bf16.msra.mxu1 %v2051_v7  ;;  %v859_v26 = vadd.f32 %v842_v22, %v777_v48  ;;  %v2066_v2 = vld [vmem:[#allocation10 + $0x20] sm:$0xff]   ;;  %v2075_v61 = vld [vmem:[#allocation11 + $0x30] sm:$0xff]   ;;  %v2076_v7 = vld [vmem:[#allocation11 + $0x38] sm:$0xff]  }
 0x1a1   :  { %2438 = vmatprep.subr.bf16.mxu0 %v2044_v19  ;;  %2470 = vmatprep.subr.bf16.mxu1 %v2060_v21  ;;  %v861_v27 = vadd.f32 %v850_v10, %v779_v14 }
 0x1a2   :  { %v868_v9 = vmax.f32 %v860_v23, 0.0  ;;  %v870_v49 = vmax.f32 %v862_v25, 0.0  ;;  %v867_v38 = vmax.f32 %v859_v26, 0.0 }
 0x1a3   :  { %v869_v39 = vmax.f32 %v861_v27, 0.0 }
 0x1a4   :  { %1335 = vmatprep.mubr.f32.mxu0 %v868_v9  ;;  %1405 = vmatprep.mubr.f32.mxu1 %v870_v49 }
 0x1a5   :  { %2440 = vmatpush3.bf16.msra.mxu0 %v2036_v28  ;;  %2472 = vmatpush3.bf16.msra.mxu1 %v2052_v29 }
 0x1a6   :  { %2442 = vmatprep.subr.bf16.mxu0 %v2045_v30  ;;  %2474 = vmatprep.subr.bf16.mxu1 %v2061_v31 }
 0x1a9   :  { %2444 = vmatpush3.bf16.msra.mxu0 %v2037_v32  ;;  %2476 = vmatpush3.bf16.msra.mxu1 %v2053_v33 }
 0x1aa   :  { %2446 = vmatprep.subr.bf16.mxu0 %v2046_v34  ;;  %2478 = vmatprep.subr.bf16.mxu1 %v2062_v35 }
 0x1ad   :  { %2448 = vmatpush3.bf16.msra.mxu0 %v2038_v36  ;;  %2480 = vmatpush3.bf16.msra.mxu1 %v2054_v37 }
 0x1ae   :  { %2481 = vmatprep.subr.bf16.mxu0 %v2758_v63  ;;  %2505 = vmatprep.subr.bf16.mxu1 %v2758_v63 }
 0x1b0   :  { %1336 = vmatmul.mubr.f32.vlgmr.msra.gmra.mrb[6].mxu0 %v867_v38  ;;  %1406 = vmatmul.mubr.f32.vlgmr.msra.gmra.mrb[6].mxu1 %v869_v39 }
 0x1b1   :  { %2483 = vmatpush3.bf16.msra.mxu0 %v1937_v6  ;;  %2283 = vmatprep.mubr.msk.f32.mxu0 %vm2759_vm1, %v2756_v0 }
 0x1b2   :  { %2484 = vmatprep.subr.bf16.mxu0 %v2758_v63  ;;  %2318 = vmatprep.mubr.msk.f32.mxu1 %vm2759_vm1, %v2756_v0 }
 0x1b3   :  { %2507 = vmatpush3.bf16.msra.mxu1 %v1969_v59 }
 0x1b4   :  { %2508 = vmatprep.subr.bf16.mxu1 %v2758_v63 }
 0x1b5   :  { %2486 = vmatpush3.bf16.msra.mxu0 %v2063_v4 }
 0x1b6   :  { %2487 = vmatprep.subr.bf16.mxu0 %v2758_v63 }
 0x1b7   :  { %2510 = vmatpush3.bf16.msra.mxu1 %v2070_v62 }
 0x1b8   :  { %2511 = vmatprep.subr.bf16.mxu1 %v2758_v63 }
 0x1b9   :  { %2489 = vmatpush3.bf16.msra.mxu0 %v2064_v17 }
 0x1ba   :  { %2490 = vmatprep.subr.bf16.mxu0 %v2758_v63 }
 0x1bb   :  { %2513 = vmatpush3.bf16.msra.mxu1 %v2071_v15 }
 0x1bc   :  { %2514 = vmatprep.subr.bf16.mxu1 %v2758_v63 }
 0x1bd   :  { %2492 = vmatpush3.bf16.msra.mxu0 %v2065_v40 }
 0x1be   :  { %2493 = vmatprep.subr.bf16.mxu0 %v2758_v63 }
 0x1bf   :  { %2516 = vmatpush3.bf16.msra.mxu1 %v2072_v50 }
 0x1c0   :  { %2517 = vmatprep.subr.bf16.mxu1 %v2758_v63 }
 0x1c1   :  { %2495 = vmatpush3.bf16.msra.mxu0 %v2066_v2  ;;  %v1585_v2 = vrot.slane %v3080_v41, %v3016_v20 }
 0x1c2   :  { %2496 = vmatprep.subr.bf16.mxu0 %v2758_v63 }
 0x1c3   :  { %2519 = vmatpush3.bf16.msra.mxu1 %v2073_v1 }
 0x1c4   :  { %2520 = vmatprep.subr.bf16.mxu1 %v2758_v63 }
 0x1c5   :  { %2498 = vmatpush3.bf16.msra.mxu0 %v2067_v24 }
 0x1c6   :  { %2499 = vmatprep.subr.bf16.mxu0 %v2758_v63 }
 0x1c7   :  { %2522 = vmatpush3.bf16.msra.mxu1 %v2074_v5 }
 0x1c8   :  { %2523 = vmatprep.subr.bf16.mxu1 %v2758_v63 }
 0x1c9   :  { %2501 = vmatpush3.bf16.msra.mxu0 %v2068_v8 }
 0x1ca   :  { %2502 = vmatprep.subr.bf16.mxu0 %v2758_v63 }
 0x1cb   :  { %2525 = vmatpush3.bf16.msra.mxu1 %v2075_v61 }
 0x1cc   :  { %2526 = vmatprep.subr.bf16.mxu1 %v2758_v63 }
 0x1cd   :  { %2504 = vmatpush3.bf16.msra.mxu0 %v2069_v60 }
 0x1cf   :  { %2528 = vmatpush3.bf16.msra.mxu1 %v2076_v7 }
 0x262   :  { %v2109_v42 = vpop.f32.mrb[4].mxu0  ;;  %v2144_v43 = vpop.f32.mrb[4].mxu1 }
 0x263   :  { %v2110_v0 = vpop.f32.mrb[5].mxu0  ;;  %v2145_v18 = vpop.f32.mrb[5].mxu1 }
 0x264   :  { %v2111_v44 = vadd.f32 %v2110_v0, %v2109_v42  ;;  %v2146_v48 = vadd.f32 %v2145_v18, %v2144_v43 }
 0x266   :  { %v1198_v56 = vadd.f32 %v2111_v44, %v1130_v47 }
 0x268   :  { %v1268_v14 = vadd.f32 %v2146_v48, %v1198_v56 }
 0x283   :  { %v2179_v52 = vpop.f32.mrb[6].mxu0  ;;  %v2214_v13 = vpop.f32.mrb[6].mxu1 }
 0x284   :  { %v2180_v53 = vpop.f32.mrb[7].mxu0  ;;  %v2215_v54 = vpop.f32.mrb[7].mxu1 }
 0x285   :  { %v2181_v51 = vadd.f32 %v2180_v53, %v2179_v52  ;;  %v2216_v55 = vadd.f32 %v2215_v54, %v2214_v13 }
 0x287   :  { %v1338_v57 = vadd.f32 %v2181_v51, %v1268_v14 }
 0x289   :  { %v1408_v45 = vadd.f32 %v2216_v55, %v1338_v57 }
 0x28b   :  { %2576 = vtanh.f32 %v1408_v45 }
 0x295   :  { %v2577_v58 = vpop.eup %2576 }
 0x296   :  { %2284 = vmatmul.mubr.f32.vlgmr.msra.gmra.mrb[8].mxu0 %v2577_v58 }
 0x369   :  { %v1510_v11 = vpop.f32.mrb[8].mxu0 }
 0x36a   :  { %v1514_v3 = vrot.slane %v1510_v11, 4  ;;  %v1521_v12 = vmul.f32 %v1510_v11, %v1510_v11  ;;  %v2285_v19 = vpop.f32.mrb[9].mxu0 }
 0x36c   :  { %v1515_v21 = vadd.f32 %v1514_v3, %v1510_v11  ;;  %v1522_v22 = vrot.slane %v1521_v12, 4 }
 0x36e   :  { %v1516_v10 = vrot.slane %v1515_v21, 2  ;;  %v1523_v23 = vadd.f32 %v1522_v22, %v1521_v12 }
 0x370   :  { %v1517_v25 = vadd.f32 %v1516_v10, %v1515_v21  ;;  %v1524_v26 = vrot.slane %v1523_v23, 2 }
 0x372   :  { %v1518_v27 = vrot.slane %v1517_v25, 1  ;;  %v1525_v9 = vadd.f32 %v1524_v26, %v1523_v23 }
 0x374   :  { %v1519_v49 = vadd.f32 %v1518_v27, %v1517_v25  ;;  %v1526_v28 = vrot.slane %v1525_v9, 1 }
 0x376   :  { %v1520_v29 = vmul.f32 0.125, %v1519_v49  ;;  %v1527_v30 = vadd.f32 %v1526_v28, %v1525_v9 }
 0x378   :  { %v1528_v31 = vmul.f32 0.125, %v1527_v30  ;;  %v1529_v32 = vmul.f32 %v1520_v29, %v1520_v29 }
 0x37a   :  { %v1530_v33 = vsub.f32 %v1528_v31, %v1529_v32 }
 0x37c   :  { %v1531_v34 = vadd.f32 1e-05, %v1530_v33 }
 0x37e   :  { %2578 = vrsqrt.f32 %v1531_v34 }
 0x388   :  { %v2579_v35 = vpop.eup %2578 }
 0x389   :  { %v1533_v36 = vmul.f32 %v2579_v35, %v3080_v41 }
 0x38b   :  { %v1534_v37 = vmul.f32 %v1533_v36, %v1520_v29  ;;  %v1542_v39 = vrot.slane %v1533_v36, %v3013_v46 }
 0x38d   :  { %v1536_v38 = vrot.slane %v1534_v37, 7  ;;  %v1543_v63 = vmul.f32 %v1542_v39, %v1510_v11 }
 0x38f   :  { %v1538_v6 = vsub.f32 %v3080_v41, %v1536_v38 }
 0x391   :  { %v1547_v4 = vrot.slane %v1538_v6, %v2990_v16 }
 0x393   :  { %v1548_v17 = vadd.f32 %v1547_v4, %v1543_v63 }
 0x395   :  { %v1549_v40 = vmax.f32 %v1548_v17, 0.0 }
 0x397   :  { %2319 = vmatmul.mubr.f32.vlgmr.msra.gmra.mrb[8].mxu1 %v1549_v40 }
 0x46a   :  { %v1652_v24 = vpop.f32.mrb[8].mxu1 }
 0x46b   :  { %v1653_v8 = vadd.f32 %v1652_v24, %v1585_v2  ;;  %v2320_v60 = vpop.f32.mrb[9].mxu1 }
 0x46d   :  { %2580 = vtanh.f32 %v1653_v8 }
 0x477   :  { %v2581_v42 = vpop.eup %2580 }
 0x478   :  { %1657 = vst [vmem:[#allocation13] sm:$0xff] %v2581_v42 }
 0x479   :  { %2725 = shalt.err (!%p2722_p10)
}
 0x47a   :  { %s2726_s29 = scalar_lea.hbm %s3116_s7, 128 }
 0x47b   :  { %p2727_p11 = scmp.ne.s32.totalorder %s3116_s7, %s2726_s29  ;;  %p2730_p12 = scmp.lt.u32.totalorder %s2726_s29, %s3116_s7 }
 0x47d   :  { %p2732_p13 = pnand %p2730_p12, %p2727_p11 }
 0x47f   :  { %2735 = shalt.err (!%p2732_p13)
}
 0x480   :  { %1667 = dma.vmem_to_hbm [thread:$0]  %s1665_s25, 128, %s3116_s7, [#allocation4]  }
 0x481   :  { %2744 = dma.done.wait [#allocation4], 128  }
 0x482   :  { %2745 = vsyncadd [#allocation4], 4294967168 }
 0x483   :  { %1671 = vsyncpa [#allocation3], 1 }
 0x484   :  { %1672 = vsyncpa [#allocation6], 1 }
 0x485   :  { %1673 = vsyncpa [#allocation9], 1 }
 0x486   :  { %1674 = vsyncpa [#allocation12], 1 }
 0x487   :  { %1675 = vsyncpa [#allocation4], 1 }

</bundles_post_ra>
